<compile_context>
chip_gen: v7x
topology: tpu7x:2x2x1
jax: 0.10.0
libtpu: 0.0.40
codegen_flags: <defaults>
</compile_context>

<pallas_src>
import functools

import jax
import jax.numpy as jnp
from jax import lax
from jax.experimental import pallas as pl
from jax.experimental.pallas import tpu as pltpu

BN_EPS = 1e-5
LANE = 128
SUB = 8


def _round_up(x, m):
    return (x + m - 1) // m * m


# ----------------------------------------------------------------------------
# Pass 1: conv GEMM (transposed / compact) + per-tile partial statistics.
# ----------------------------------------------------------------------------
def _conv_stats_kernel(pT_ref, w_ref, y_ref, sum_ref, sq_ref):
    # pT_ref: (K, TILE_P) f32 (streaming)    w_ref: (COUT_SUB, K) f32 (resident)
    # y_ref:  (COUT_SUB, TILE_P) f32         sum_ref/sq_ref: (1, COUT_SUB, 1) f32
    y = jnp.dot(w_ref[...], pT_ref[...],
                preferred_element_type=jnp.float32)          # MXU, (8, TILE_P)
    y_ref[...] = y                                           # lane-dense store
    # Per-channel streaming sum / sum-of-squares (lane-axis reduce -> XLU,
    # off the critical path of the mem-bound pass).  Full-block stores, no
    # concatenate/relayout in the epilogue.
    sum_ref[...] = jnp.sum(y, axis=1, keepdims=True)[None]       # (1, 8, 1)
    sq_ref[...] = jnp.sum(y * y, axis=1, keepdims=True)[None]    # (1, 8, 1)


# ----------------------------------------------------------------------------
# Pass 2: cross-tile stats reduce + folded BN affine + ReLU (all in-kernel).
# ----------------------------------------------------------------------------
def _bn_relu_kernel(y_ref, sum_ref, sq_ref, gb_ref, out_ref, *, inv_p):
    # y_ref: (COUT_SUB, TILE_P)   sum_ref/sq_ref: (NUM_TILES, COUT_SUB, 1) resident
    # gb_ref: (COUT_SUB, 2) resident  [gamma | beta]
    num_tiles = sum_ref.shape[0]
    # num_tiles is static and modest at tile_p>=512, so an unrolled
    # accumulation of one vreg per tile is cheap and lowers trivially.
    s1 = sum_ref[0]
    s2 = sq_ref[0]
    for t in range(1, num_tiles):
        s1 = s1 + sum_ref[t]
        s2 = s2 + sq_ref[t]
    mean = s1 * inv_p                                            # (8, 1)
    var = jnp.maximum(s2 * inv_p - mean * mean, 0.0)             # biased var
    gamma = gb_ref[:, 0:1]
    beta = gb_ref[:, 1:2]
    scale = gamma * lax.rsqrt(var + BN_EPS)                      # (8, 1)
    shift = beta - mean * scale
    out_ref[...] = jnp.maximum(y_ref[...] * scale + shift, 0.0)  # lane bcast


def _im2col_t(x, kh, kw, stride):
    """x: (N, Cin, H, W) -> patches^T (Cin*kh*kw, N*Ho*Wo); K ordered (Cin, kh, kw)."""
    n, c, h, w = x.shape
    ho = (h - kh) // stride + 1
    wo = (w - kw) // stride + 1
    cols = []
    for i in range(kh):
        for j in range(kw):
            cols.append(x[:, :, i:i + stride * ho:stride, j:j + stride * wo:stride])
    patches = jnp.stack(cols, axis=2)                    # (N, Cin, kh*kw, Ho, Wo)
    patches_t = patches.transpose(1, 2, 0, 3, 4)         # (Cin, kh*kw, N, Ho, Wo)
    return patches_t.reshape(c * kh * kw, n * ho * wo), ho, wo


@functools.partial(jax.jit, static_argnames=("kernel_size", "stride", "tile_p"))
def conv_unit_forward(x, conv_w, conv_b, bn_gamma, bn_beta, *,
                      kernel_size, stride, tile_p=1024):
    """x: (N, Cin, H, W) f32 -> (N, Cout, Ho, Wo) f32 (training-mode BN)."""
    del conv_b  # exactly cancelled by the BN mean subtraction (training mode)

    n = x.shape[0]
    cout, cin, kh, kw = conv_w.shape
    assert kh == kernel_size and kw == kernel_size

    patches_t, ho, wo = _im2col_t(x, kh, kw, stride)     # (K, P)
    k_dim, p_real = patches_t.shape

    cout_sub = _round_up(cout, SUB)                      # 8-sublane channel tile
    # tile_p: multiple of 128 lanes, clamped so it never exceeds what P needs.
    tile_p = max(LANE, (tile_p // LANE) * LANE)
    tile_p = min(tile_p, _round_up(p_real, LANE))
    p_pad = _round_up(p_real, tile_p)
    num_tiles = p_pad // tile_p

    if p_pad != p_real:
        # Zero columns -> y == 0 exactly -> contribute nothing to sum/sumsq
        # (and we divide by the real P below); sliced off at the end.
        patches_t = jnp.pad(patches_t, ((0, 0), (0, p_pad - p_real)))

    # (Cout, Cin, kh, kw) -> (Cout, K); pad channels to the 8-sublane tile.
    w_mat = jnp.pad(conv_w.reshape(cout, k_dim), ((0, cout_sub - cout), (0, 0)))
    gb = jnp.stack([jnp.pad(bn_gamma, (0, cout_sub - cout)),
                    jnp.pad(bn_beta, (0, cout_sub - cout))], axis=1)  # (8, 2)

    cparams = pltpu.CompilerParams(
        dimension_semantics=("parallel",),               # v7x: shard P over 2 TCs
        vmem_limit_bytes=32 * 1024 * 1024)               # headroom even on v7x (64 MiB)

    # ---- Pass 1: conv GEMM + per-tile partial stats -------------------------
    y_t, psum, psq = pl.pallas_call(
        _conv_stats_kernel,
        out_shape=(
            jax.ShapeDtypeStruct((cout_sub, p_pad), jnp.float32),
            jax.ShapeDtypeStruct((num_tiles, cout_sub, 1), jnp.float32),
            jax.ShapeDtypeStruct((num_tiles, cout_sub, 1), jnp.float32),
        ),
        grid=(num_tiles,),
        in_specs=[
            pl.BlockSpec((k_dim, tile_p), lambda i: (0, i)),       # streaming
            pl.BlockSpec((cout_sub, k_dim), lambda i: (0, 0)),     # resident
        ],
        out_specs=(
            pl.BlockSpec((cout_sub, tile_p), lambda i: (0, i)),
            pl.BlockSpec((1, cout_sub, 1), lambda i: (i, 0, 0)),
            pl.BlockSpec((1, cout_sub, 1), lambda i: (i, 0, 0)),
        ),
        compiler_params=cparams,
    )(patches_t, w_mat)

    # ---- Pass 2: stats reduce + BN affine + ReLU, all inside the kernel -----
    out_t = pl.pallas_call(
        functools.partial(_bn_relu_kernel, inv_p=1.0 / p_real),
        out_shape=jax.ShapeDtypeStruct((cout_sub, p_pad), jnp.float32),
        grid=(num_tiles,),
        in_specs=[
            pl.BlockSpec((cout_sub, tile_p), lambda i: (0, i)),          # streaming
            pl.BlockSpec((num_tiles, cout_sub, 1), lambda i: (0, 0, 0)),  # resident
            pl.BlockSpec((num_tiles, cout_sub, 1), lambda i: (0, 0, 0)),  # resident
            pl.BlockSpec((cout_sub, 2), lambda i: (0, 0)),                # resident
        ],
        out_specs=pl.BlockSpec((cout_sub, tile_p), lambda i: (0, i)),
        compiler_params=cparams,
    )(y_t, psum, psq, gb)

    # Compact (Cout, P) -> (Cout, N, Ho, Wo) -> NCHW: cheap slice + leading-dim
    # permute only (no 128-lane padded buffer to re-read).
    out = out_t[:cout, :p_real]
    return out.reshape(cout, n, ho, wo).transpose(1, 0, 2, 3)


def _reference(x, conv_w, conv_b, bn_gamma, bn_beta, stride):
    """Pure-JAX reference of the PyTorch forward (training-mode BN)."""
    y = lax.conv_general_dilated(
        x, conv_w, window_strides=(stride, stride), padding="VALID",
        dimension_numbers=("NCHW", "OIHW", "NCHW"))
    y = y + conv_b.reshape(1, -1, 1, 1)
    mean = jnp.mean(y, axis=(0, 2, 3), keepdims=True)
    var = jnp.mean((y - mean) ** 2, axis=(0, 2, 3), keepdims=True)
    y = (y - mean) / jnp.sqrt(var + BN_EPS)
    y = y * bn_gamma.reshape(1, -1, 1, 1) + bn_beta.reshape(1, -1, 1, 1)
    return jnp.maximum(y, 0.0)


if __name__ == "__main__":
    # ConvUnit(in_channels=4, out_channels=8, kernel_size=3, stride=1)
    # applied to x of shape (2, 4, 16, 16).
    N, CIN, H, W = 2, 4, 16, 16
    COUT, KSIZE, STRIDE = 8, 3, 1

    key = jax.random.PRNGKey(0)
    kx, kw, kb = jax.random.split(key, 3)

    x = jax.random.normal(kx, (N, CIN, H, W), dtype=jnp.float32)
    fan_in = CIN * KSIZE * KSIZE
    conv_w = jax.random.uniform(kw, (COUT, CIN, KSIZE, KSIZE), jnp.float32,
                                minval=-1.0, maxval=1.0) / jnp.sqrt(fan_in)
    conv_b = jax.random.uniform(kb, (COUT,), jnp.float32,
                                minval=-1.0, maxval=1.0) / jnp.sqrt(fan_in)
    bn_gamma = jnp.ones((COUT,), jnp.float32)   # nn.BatchNorm2d default weight
    bn_beta = jnp.zeros((COUT,), jnp.float32)   # nn.BatchNorm2d default bias

    # tile_p=128 is the small-P fallback (P = 2*14*14 = 392 -> 4 grid tiles,
    # exercising the multi-tile stats path); default is 1024 for realistic P.
    out = conv_unit_forward(x, conv_w, conv_b, bn_gamma, bn_beta,
                            kernel_size=KSIZE, stride=STRIDE, tile_p=128)
    out = jax.block_until_ready(out)

    ref = _reference(x, conv_w, conv_b, bn_gamma, bn_beta, STRIDE)
    assert out.shape == ref.shape == (N, COUT, (H - KSIZE) // STRIDE + 1,
                                      (W - KSIZE) // STRIDE + 1)
    assert jnp.allclose(out, ref, atol=1e-4, rtol=1e-4)

    print("KERNEL_OK")
</pallas_src>

<mosaic_0001>
module attributes {stable_mosaic.version = 11 : i64} {
  func.func @_conv_stats_kernel(%arg0: i32, %arg1: memref<36x128xf32, #tpu.memory_space<vmem>>, %arg2: memref<8x36xf32, #tpu.memory_space<vmem>>, %arg3: memref<8x128xf32, #tpu.memory_space<vmem>>, %arg4: memref<1x8x1xf32, #tpu.memory_space<vmem>>, %arg5: memref<1x8x1xf32, #tpu.memory_space<vmem>>) attributes {dimension_semantics = [#tpu.dimension_semantics<parallel>], iteration_bounds = array<i64: 4>, scalar_prefetch = 0 : i64, scratch_operands = 0 : i64, tpu.core_type = #tpu.core_type<tc>, window_params = [{transform_indices = @transform_0, window_bounds = array<i64: 36, 128>}, {pipeline_mode = #tpu.pipeline_mode<synchronous>, transform_indices = @transform_1, window_bounds = array<i64: 8, 36>}, {transform_indices = @transform_2, window_bounds = array<i64: 8, 128>}, {transform_indices = @transform_3, window_bounds = array<i64: 1, 8, 1>}, {transform_indices = @transform_4, window_bounds = array<i64: 1, 8, 1>}]} {
    %c0 = arith.constant 0 : index
    %c0_0 = arith.constant 0 : index
    %0 = vector.load %arg2[%c0, %c0_0] : memref<8x36xf32, #tpu.memory_space<vmem>>, vector<8x36xf32>
    %c0_1 = arith.constant 0 : index
    %c0_2 = arith.constant 0 : index
    %1 = vector.load %arg1[%c0_1, %c0_2] : memref<36x128xf32, #tpu.memory_space<vmem>>, vector<36x128xf32>
    %cst = arith.constant dense<0.000000e+00> : vector<8x128xf32>
    %2 = tpu.matmul %0, %1, %cst {dimension_numbers = #tpu.dot_dimension_numbers<[1], [0], [0], [1], [0, 0, 1, 1], [], []>} : vector<8x36xf32>, vector<36x128xf32>, vector<8x128xf32> -> vector<8x128xf32>
    %c0_3 = arith.constant 0 : index
    %c0_4 = arith.constant 0 : index
    %3 = vector.load %arg3[%c0_3, %c0_4] : memref<8x128xf32, #tpu.memory_space<vmem>>, vector<8x128xf32>
    tpu.vector_store %arg3[%c0_3, %c0_4], %2 {strides = array<i32>} : memref<8x128xf32, #tpu.memory_space<vmem>>, vector<8x128xf32>,
    %cst_5 = arith.constant dense<0.000000e+00> : vector<8xf32>
    %4 = vector.multi_reduction <add>, %2, %cst_5 [1] : vector<8x128xf32> to vector<8xf32>
    %5 = vector.shape_cast %4 : vector<8xf32> to vector<8x1xf32>
    %6 = vector.shape_cast %5 : vector<8x1xf32> to vector<1x8x1xf32>
    %c0_6 = arith.constant 0 : index
    %c0_7 = arith.constant 0 : index
    %c0_8 = arith.constant 0 : index
    %7 = vector.load %arg4[%c0_6, %c0_7, %c0_8] : memref<1x8x1xf32, #tpu.memory_space<vmem>>, vector<1x8x1xf32>
    tpu.vector_store %arg4[%c0_6, %c0_7, %c0_8], %6 {strides = array<i32>} : memref<1x8x1xf32, #tpu.memory_space<vmem>>, vector<1x8x1xf32>,
    %8 = arith.mulf %2, %2 : vector<8x128xf32>
    %cst_9 = arith.constant dense<0.000000e+00> : vector<8xf32>
    %9 = vector.multi_reduction <add>, %8, %cst_9 [1] : vector<8x128xf32> to vector<8xf32>
    %10 = vector.shape_cast %9 : vector<8xf32> to vector<8x1xf32>
    %11 = vector.shape_cast %10 : vector<8x1xf32> to vector<1x8x1xf32>
    %c0_10 = arith.constant 0 : index
    %c0_11 = arith.constant 0 : index
    %c0_12 = arith.constant 0 : index
    %12 = vector.load %arg5[%c0_10, %c0_11, %c0_12] : memref<1x8x1xf32, #tpu.memory_space<vmem>>, vector<1x8x1xf32>
    tpu.vector_store %arg5[%c0_10, %c0_11, %c0_12], %11 {strides = array<i32>} : memref<1x8x1xf32, #tpu.memory_space<vmem>>, vector<1x8x1xf32>,
    return
  }
  func.func @transform_0(%arg0: i32) -> (i32, i32) {
    %c0_i32 = arith.constant 0 : i32
    %c0_i32_0 = arith.constant 0 : i32
    return %c0_i32, %arg0 : i32, i32
  }
  func.func @transform_1(%arg0: i32) -> (i32, i32) {
    %c0_i32 = arith.constant 0 : i32
    %c0_i32_0 = arith.constant 0 : i32
    %c0_i32_1 = arith.constant 0 : i32
    return %c0_i32, %c0_i32_0 : i32, i32
  }
  func.func @transform_2(%arg0: i32) -> (i32, i32) {
    %c0_i32 = arith.constant 0 : i32
    %c0_i32_0 = arith.constant 0 : i32
    return %c0_i32, %arg0 : i32, i32
  }
  func.func @transform_3(%arg0: i32) -> (i32, i32, i32) {
    %c0_i32 = arith.constant 0 : i32
    %c0_i32_0 = arith.constant 0 : i32
    %c0_i32_1 = arith.constant 0 : i32
    return %arg0, %c0_i32, %c0_i32_0 : i32, i32, i32
  }
  func.func @transform_4(%arg0: i32) -> (i32, i32, i32) {
    %c0_i32 = arith.constant 0 : i32
    %c0_i32_0 = arith.constant 0 : i32
    %c0_i32_1 = arith.constant 0 : i32
    return %arg0, %c0_i32, %c0_i32_0 : i32, i32, i32
  }
}

module attributes {stable_mosaic.version = 11 : i64} {
  func.func @_bn_relu_kernel(%arg0: i32, %arg1: memref<8x128xf32, #tpu.memory_space<vmem>>, %arg2: memref<4x8x1xf32, #tpu.memory_space<vmem>>, %arg3: memref<4x8x1xf32, #tpu.memory_space<vmem>>, %arg4: memref<8x2xf32, #tpu.memory_space<vmem>>, %arg5: memref<8x128xf32, #tpu.memory_space<vmem>>) attributes {dimension_semantics = [#tpu.dimension_semantics<parallel>], iteration_bounds = array<i64: 4>, scalar_prefetch = 0 : i64, scratch_operands = 0 : i64, tpu.core_type = #tpu.core_type<tc>, window_params = [{transform_indices = @transform_0, window_bounds = array<i64: 8, 128>}, {pipeline_mode = #tpu.pipeline_mode<synchronous>, transform_indices = @transform_1, window_bounds = array<i64: 4, 8, 1>}, {pipeline_mode = #tpu.pipeline_mode<synchronous>, transform_indices = @transform_2, window_bounds = array<i64: 4, 8, 1>}, {pipeline_mode = #tpu.pipeline_mode<synchronous>, transform_indices = @transform_3, window_bounds = array<i64: 8, 2>}, {transform_indices = @transform_4, window_bounds = array<i64: 8, 128>}]} {
    %c0 = arith.constant 0 : index
    %c0_0 = arith.constant 0 : index
    %c0_1 = arith.constant 0 : index
    %0 = vector.load %arg2[%c0, %c0_0, %c0_1] : memref<4x8x1xf32, #tpu.memory_space<vmem>>, vector<1x8x1xf32>
    %1 = vector.shape_cast %0 : vector<1x8x1xf32> to vector<8x1xf32>
    %c0_2 = arith.constant 0 : index
    %c0_3 = arith.constant 0 : index
    %c0_4 = arith.constant 0 : index
    %2 = vector.load %arg3[%c0_2, %c0_3, %c0_4] : memref<4x8x1xf32, #tpu.memory_space<vmem>>, vector<1x8x1xf32>
    %3 = vector.shape_cast %2 : vector<1x8x1xf32> to vector<8x1xf32>
    %c1 = arith.constant 1 : index
    %c0_5 = arith.constant 0 : index
    %c0_6 = arith.constant 0 : index
    %4 = vector.load %arg2[%c1, %c0_5, %c0_6] : memref<4x8x1xf32, #tpu.memory_space<vmem>>, vector<1x8x1xf32>
    %5 = vector.shape_cast %4 : vector<1x8x1xf32> to vector<8x1xf32>
    %6 = arith.addf %1, %5 : vector<8x1xf32>
    %c1_7 = arith.constant 1 : index
    %c0_8 = arith.constant 0 : index
    %c0_9 = arith.constant 0 : index
    %7 = vector.load %arg3[%c1_7, %c0_8, %c0_9] : memref<4x8x1xf32, #tpu.memory_space<vmem>>, vector<1x8x1xf32>
    %8 = vector.shape_cast %7 : vector<1x8x1xf32> to vector<8x1xf32>
    %9 = arith.addf %3, %8 : vector<8x1xf32>
    %c2 = arith.constant 2 : index
    %c0_10 = arith.constant 0 : index
    %c0_11 = arith.constant 0 : index
    %10 = vector.load %arg2[%c2, %c0_10, %c0_11] : memref<4x8x1xf32, #tpu.memory_space<vmem>>, vector<1x8x1xf32>
    %11 = vector.shape_cast %10 : vector<1x8x1xf32> to vector<8x1xf32>
    %12 = arith.addf %6, %11 : vector<8x1xf32>
    %c2_12 = arith.constant 2 : index
    %c0_13 = arith.constant 0 : index
    %c0_14 = arith.constant 0 : index
    %13 = vector.load %arg3[%c2_12, %c0_13, %c0_14] : memref<4x8x1xf32, #tpu.memory_space<vmem>>, vector<1x8x1xf32>
    %14 = vector.shape_cast %13 : vector<1x8x1xf32> to vector<8x1xf32>
    %15 = arith.addf %9, %14 : vector<8x1xf32>
    %c3 = arith.constant 3 : index
    %c0_15 = arith.constant 0 : index
    %c0_16 = arith.constant 0 : index
    %16 = vector.load %arg2[%c3, %c0_15, %c0_16] : memref<4x8x1xf32, #tpu.memory_space<vmem>>, vector<1x8x1xf32>
    %17 = vector.shape_cast %16 : vector<1x8x1xf32> to vector<8x1xf32>
    %18 = arith.addf %12, %17 : vector<8x1xf32>
    %c3_17 = arith.constant 3 : index
    %c0_18 = arith.constant 0 : index
    %c0_19 = arith.constant 0 : index
    %19 = vector.load %arg3[%c3_17, %c0_18, %c0_19] : memref<4x8x1xf32, #tpu.memory_space<vmem>>, vector<1x8x1xf32>
    %20 = vector.shape_cast %19 : vector<1x8x1xf32> to vector<8x1xf32>
    %21 = arith.addf %15, %20 : vector<8x1xf32>
    %cst = arith.constant 0.00255102036 : f32
    %22 = vector.broadcast %cst : f32 to vector<8x1xf32>
    %23 = arith.mulf %18, %22 : vector<8x1xf32>
    %cst_20 = arith.constant 0.00255102036 : f32
    %24 = vector.broadcast %cst_20 : f32 to vector<8x1xf32>
    %25 = arith.mulf %21, %24 : vector<8x1xf32>
    %26 = arith.mulf %23, %23 : vector<8x1xf32>
    %27 = arith.subf %25, %26 : vector<8x1xf32>
    %cst_21 = arith.constant 0.000000e+00 : f32
    %28 = vector.broadcast %cst_21 : f32 to vector<8x1xf32>
    %29 = arith.maximumf %27, %28 : vector<8x1xf32>
    %c0_22 = arith.constant 0 : index
    %c0_23 = arith.constant 0 : index
    %30 = vector.load %arg4[%c0_22, %c0_23] : memref<8x2xf32, #tpu.memory_space<vmem>>, vector<8x1xf32>
    %c0_24 = arith.constant 0 : index
    %c1_25 = arith.constant 1 : index
    %31 = vector.load %arg4[%c0_24, %c1_25] : memref<8x2xf32, #tpu.memory_space<vmem>>, vector<8x1xf32>
    %cst_26 = arith.constant 9.99999974E-6 : f32
    %32 = vector.broadcast %cst_26 : f32 to vector<8x1xf32>
    %33 = arith.addf %29, %32 : vector<8x1xf32>
    %34 = math.rsqrt %33 : vector<8x1xf32>
    %35 = arith.mulf %30, %34 : vector<8x1xf32>
    %36 = arith.mulf %23, %35 : vector<8x1xf32>
    %37 = arith.subf %31, %36 : vector<8x1xf32>
    %c0_27 = arith.constant 0 : index
    %c0_28 = arith.constant 0 : index
    %38 = vector.load %arg1[%c0_27, %c0_28] : memref<8x128xf32, #tpu.memory_space<vmem>>, vector<8x128xf32>
    %39 = vector.broadcast %35 : vector<8x1xf32> to vector<8x128xf32>
    %40 = arith.mulf %38, %39 : vector<8x128xf32>
    %41 = vector.broadcast %37 : vector<8x1xf32> to vector<8x128xf32>
    %42 = arith.addf %40, %41 : vector<8x128xf32>
    %cst_29 = arith.constant 0.000000e+00 : f32
    %43 = vector.broadcast %cst_29 : f32 to vector<8x128xf32>
    %44 = arith.maximumf %42, %43 : vector<8x128xf32>
    %c0_30 = arith.constant 0 : index
    %c0_31 = arith.constant 0 : index
    %45 = vector.load %arg5[%c0_30, %c0_31] : memref<8x128xf32, #tpu.memory_space<vmem>>, vector<8x128xf32>
    tpu.vector_store %arg5[%c0_30, %c0_31], %44 {strides = array<i32>} : memref<8x128xf32, #tpu.memory_space<vmem>>, vector<8x128xf32>,
    return
  }
  func.func @transform_0(%arg0: i32) -> (i32, i32) {
    %c0_i32 = arith.constant 0 : i32
    %c0_i32_0 = arith.constant 0 : i32
    return %c0_i32, %arg0 : i32, i32
  }
  func.func @transform_1(%arg0: i32) -> (i32, i32, i32) {
    %c0_i32 = arith.constant 0 : i32
    %c0_i32_0 = arith.constant 0 : i32
    %c0_i32_1 = arith.constant 0 : i32
    %c0_i32_2 = arith.constant 0 : i32
    return %c0_i32, %c0_i32_0, %c0_i32_1 : i32, i32, i32
  }
  func.func @transform_2(%arg0: i32) -> (i32, i32, i32) {
    %c0_i32 = arith.constant 0 : i32
    %c0_i32_0 = arith.constant 0 : i32
    %c0_i32_1 = arith.constant 0 : i32
    %c0_i32_2 = arith.constant 0 : i32
    return %c0_i32, %c0_i32_0, %c0_i32_1 : i32, i32, i32
  }
  func.func @transform_3(%arg0: i32) -> (i32, i32) {
    %c0_i32 = arith.constant 0 : i32
    %c0_i32_0 = arith.constant 0 : i32
    %c0_i32_1 = arith.constant 0 : i32
    return %c0_i32, %c0_i32_0 : i32, i32
  }
  func.func @transform_4(%arg0: i32) -> (i32, i32) {
    %c0_i32 = arith.constant 0 : i32
    %c0_i32_0 = arith.constant 0 : i32
    return %c0_i32, %arg0 : i32, i32
  }
}

</mosaic_0001>

<bundles_post_ra>
// kernel: conv_unit_forward.2
= control target key start
LH: loop header
LB: loop body
LE: loop exit
PB: predicated region body
PF: predicated region fallthrough
CT: control target
= control target key end

     0   :  { %s600_s15 = smov 0   ;;  %s602_s16 = smov 0   ;;  %s663_s0 = inlined_call_operand.vmem [shape: f32[36,512], index: 0, kind: input, shape index: {}]   ;;  %s664_s1 = inlined_call_operand.vmem [shape: f32[8,36], index: 1, kind: input, shape index: {}]   ;;  %s665_s2 = inlined_call_operand.vmem [shape: f32[8,512], index: 2, kind: output, shape index: {0}]   ;;  %s666_s3 = inlined_call_operand.vmem [shape: f32[4,8,1], index: 3, kind: output, shape index: {1}]   ;;  %s667_s4 = inlined_call_operand.vmem [shape: f32[4,8,1], index: 4, kind: output, shape index: {2}]  }
   0x1   :  { %s604_s17 = smov 0  }
   0x2 LB: > { %s481_s18 = sadd.s32 4294967295, %s570_s17   ;;  %s617_s19 = sadd.s32 1, %s570_s17   ;;  %s570_s17 = sphi %s604_s17, %s670_s17   ;;  %s566_s16 = sphi %s602_s16, %s669_s16   ;;  %s562_s15 = sphi %s600_s15, %s668_s15  }
   0x3   : > { %s19_s20 = ssub.s32 %s570_s17, %s617_s19  ;;  %s22_s21 = sadd.s32 1, %s566_s16 }
   0x4   : > { %p20_p0 = scmp.eq.s32.totalorder %s19_s20, 0  ;;  %p29_p1 = scmp.ne.s32.totalorder %s566_s16, %s562_s15 }
   0x5   : > { %p30_p2 = scmp.eq.s32.totalorder %s570_s17, 0  ;;  %p484_p4 = scmp.ge.s32.totalorder %s570_s17, 4 }
   0x6   : > { %s626_s22 = scalar_select %p20_p0, %s566_s16, %s22_s21  }
   0x7   : > { %p31_p3 = por %p30_p2, %p29_p1  ;;  %157 = sbr.rel (%p484_p4) target bundleno = 23 (0x17), region = 20 }
   0xe   : > { %160 = sbr.rel (!%p31_p3) target bundleno = 23 (0x17), region = 24  ;;  %s162_s23 = sand.u32 (%p31_p3), 1, %s566_s16  }
   0xf   : > { %s485_s24 = sshll.u32 (%p31_p3), %s570_s17, 3  ;;  %s519_s25 = smul.u32 (%p31_p3), 40, %s162_s23 }
  0x10   : > { %s166_s28 = scalar_lea.vmem (%p31_p3), %s663_s0, %s485_s24 }
  0x11   : > { %v202_v0 = vld [vmem:[%s166_s28] sm:$0xff] (%p31_p3)  ;;  %s164_s29 = scalar_lea.vmem (%p31_p3), [#allocation2], %s519_s25 }
  0x12   : > { %v204_v1 = vld [vmem:[%s166_s28 + $0x20] sm:$0xff] (%p31_p3)  ;;  %203 = vst [vmem:[%s164_s29] sm:$0xff] (%p31_p3), %v202_v0 }
  0x13   : > { %v206_v2 = vld [vmem:[%s166_s28 + $0x40] sm:$0xff] (%p31_p3)  ;;  %205 = vst [vmem:[%s164_s29 + $0x8] sm:$0xff] (%p31_p3), %v204_v1 }
  0x14   : > { %v208_v3 = vld [vmem:[%s166_s28 + $0x60] sm:$0xff] (%p31_p3)  ;;  %207 = vst [vmem:[%s164_s29 + $0x10] sm:$0xff] (%p31_p3), %v206_v2 }
  0x15   : > { %v210_v4 = vld [vmem:[%s166_s28 + $0x80] sm:$0xff]  ;;  %209 = vst [vmem:[%s164_s29 + $0x18] sm:$0xff] %v208_v3 }
  0x16   : > { %211 = vst [vmem:[%s164_s29 + $0x20] sm:$0xff] %v210_v4 }
  0x17 PF: > { %p486_p5 = scmp.ge.s32.totalorder %s570_s17, 1  ;;  %p216_p6 = scmp.lt.s32.totalorder %s570_s17, 5 }
  0x19   : > { %p217_p7 = pnand %p486_p5, %p216_p6 }
  0x1a   : > { %s223_s30 = sand.u32 (!%p217_p7), 1, %s562_s15   ;;  %v572_v5 = vmov (!%p217_p7), 0.0|0.0   ;;  %vm573_vm0 = vmmov (!%p217_p7), 0   ;;  %v574_v6 = vmov (!%p217_p7), 0.0   ;;  %vm277_vm1 = vcmask (!%p217_p7), 1043456   ;;  %v267_v14 = vld [vmem:[%s664_s1] sm:$0xff] (!%p217_p7) }
  0x1b   : > { %220 = sbr.rel (%p217_p7) target bundleno = 402 (0x192), region = 62  ;;  %513 = vmatprep.subr.bf16.mxu0 (!%p217_p7), %v572_v5  ;;  %510 = vmatprep.mubr.msk.f32.mxu0 (!%p217_p7), %vm573_vm0, %v574_v6  ;;  %vm273_vm2 = vcmask (!%p217_p7), 293888   ;;  %p255_p8 = scmp.lt.s32.totalorder (!%p217_p7), %s481_s18, 3  ;;  %vm354_vm3 = vcmask (!%p217_p7), 7168  }
  0x1c   : > { %s520_s5 = smul.u32 (!%p217_p7), 40, %s223_s30 }
  0x1e   : > { %s225_s6 = scalar_lea.vmem (!%p217_p7), [#allocation2], %s520_s5 }
  0x1f   : > { %v268_v7 = vld [vmem:[%s225_s6] sm:$0xff] (!%p217_p7)  ;;  %v269_v8 = vld [vmem:[%s225_s6 + $0x8] sm:$0xff] (!%p217_p7)  ;;  %v270_v9 = vld [vmem:[%s225_s6 + $0x10] sm:$0xff] (!%p217_p7) }
  0x20   : > { %v514_v10 = vpack.c.bf16 (!%p217_p7), %v269_v8, %v268_v7  ;;  %v271_v11 = vld [vmem:[%s225_s6 + $0x18] sm:$0xff] (!%p217_p7)  ;;  %v272_v13 = vld [vmem:[%s225_s6 + $0x20] sm:$0xf] (!%p217_p7) }
  0x21   : > { %v517_v12 = vpack.c.bf16 (!%p217_p7), %v271_v11, %v270_v9 }
  0x22   : > { %515 = vmatpush3.bf16.msra.mxu0 %v514_v10  ;;  %s672_s18 = smov (!%p255_p8, %s481_s18), 3 }
  0x23   : > { %516 = vmatprep.subr.bf16.mxu0 %v572_v5  ;;  %s487_s9 = sshll.u32 %s672_s18, 3 }
  0x24   : > { %s258_s12 = scalar_lea.vmem %s665_s2, %s487_s9  ;;  %s262_s15 = scalar_lea.vmem %s666_s3, %s487_s9 }
  0x25   : > { %s266_s18 = scalar_lea.vmem %s667_s4, %s487_s9 }
  0x26   : > { %518 = vmatpush3.bf16.msra.mxu0 %v517_v12 }
  0x27   : > { %508 = vmatprep.subr.mxu0 %v574_v6 }
  0x2a   : > { %509 = vmatpush3.msk.msra.mxu0 %vm277_vm1, %v272_v13 }
  0x2b   : > { %511 = vmatmul.mubr.msk.f32.vlgmr.msra.gmra.mrb[0].mxu0 %vm273_vm2, %v267_v14 }
  0xfe   : > { %v347_v15 = vpop.f32.mrb[0].mxu0 }
  0xff   : > { %351 = vst [vmem:[%s258_s12] sm:$0xff] %v347_v15  ;;  %352 = vadd.xlane.f32.xlu0 %v347_v15  ;;  %v512_v16 = vpop.f32.mrb[1].mxu0  ;;  %v356_v17 = vmul.f32 %v347_v15, %v347_v15 }
 0x103   : > { %357 = vadd.xlane.f32.xlu0 %v356_v17 }
 0x18c   : > { %v353_v18 = vpop.xlane.xlu0 %352 }
 0x18d   : > { %355 = vst.msk [vmem:[%s262_s15] sm:$0xff] %vm354_vm3, %v353_v18 }
 0x190   : > { %v358_v19 = vpop.xlane.xlu0 %357 }
 0x191   : > { %359 = vst.msk [vmem:[%s266_s18] sm:$0xff] %vm354_vm3, %v358_v19 }
 0x192 PF: > { %p12_p9 = scmp.ge.s32.totalorder %s617_s19, 6   ;;  %s668_s15 = smov %s566_s16 }
 0x193   : > { %s669_s16 = smov %s626_s22  ;;  %s670_s17 = smov %s617_s19 }
 0x194   :  { %14 = sbr.rel (!%p12_p9) target bundleno = 2 (0x2), region = 125 }

// kernel: conv_unit_forward.3
= control target key start
LH: loop header
LB: loop body
LE: loop exit
PB: predicated region body
PF: predicated region fallthrough
CT: control target
= control target key end

     0   :  { %s363_s15 = smov 0   ;;  %s411_s0 = inlined_call_operand.vmem [shape: f32[8,512], index: 0, kind: input, shape index: {}]   ;;  %s412_s1 = inlined_call_operand.vmem [shape: f32[4,8,1], index: 1, kind: input, shape index: {}]   ;;  %s413_s2 = inlined_call_operand.vmem [shape: f32[4,8,1], index: 2, kind: input, shape index: {}]   ;;  %s414_s3 = inlined_call_operand.vmem [shape: f32[8,2], index: 3, kind: input, shape index: {}]   ;;  %s415_s4 = inlined_call_operand.vmem [shape: f32[8,512], index: 4, kind: output, shape index: {}]  }
   0x1 LB: > { %s296_s16 = sadd.s32 4294967295, %s333_s15   ;;  %p300_p0 = scmp.ge.s32.totalorder %s333_s15, 1  ;;  %s333_s15 = sphi %s363_s15, %s14_s15  }
   0x2   : > { %p161_p1 = scmp.lt.s32.totalorder %s333_s15, 5 }
   0x4   : > { %p162_p2 = pnand %p300_p0, %p161_p1 }
   0x5   : > { %v193_v0 = vld [vmem:[%s412_s1] sm:$0xff] (!%p162_p2)  ;;  %v303_v2 = vld [vmem:[%s412_s1 + $0x8] sm:$0xff] (!%p162_p2)  ;;  %v305_v5 = vld [vmem:[%s412_s1 + $0x10] sm:$0xff] (!%p162_p2)  ;;  %v335_v7 = vmov (!%p162_p2), 0   ;;  %v336_v21 = vmov (!%p162_p2), 1   ;;  %s337_s9 = smov (!%p162_p2), 1  }
   0x6   : > { %165 = sbr.rel (%p162_p2) target bundleno = 287 (0x11f), region = 36  ;;  %v194_v1 = vld [vmem:[%s413_s2] sm:$0xff] (!%p162_p2)  ;;  %v197_v3 = vadd.f32 (!%p162_p2), %v303_v2, %v193_v0  ;;  %v304_v4 = vld [vmem:[%s413_s2 + $0x8] sm:$0xff] (!%p162_p2)  ;;  %v306_v6 = vld [vmem:[%s413_s2 + $0x10] sm:$0xff] (!%p162_p2)  ;;  %322 = vset.pattern.permute.xlu0 (!%p162_p2), %v335_v7  ;;  %323 = vset.pattern.permute.xlu1 (!%p162_p2), %v336_v21  ;;  %p185_p3 = scmp.lt.s32.totalorder (!%p162_p2), %s296_s16, 3 }
   0x7   : > { %v200_v8 = vadd.f32 (!%p162_p2), %v304_v4, %v194_v1  ;;  %v307_v9 = vld [vmem:[%s412_s1 + $0x18] sm:$0xff] (!%p162_p2)  ;;  %v218_v22 = vld [vmem:[%s414_s3] sm:$0xff] (!%p162_p2) }
   0x8   : > { %v203_v10 = vadd.f32 (!%p162_p2), %v305_v5, %v197_v3  ;;  %v308_v11 = vld [vmem:[%s413_s2 + $0x18] sm:$0xff] (!%p162_p2) }
   0x9   : > { %v206_v12 = vadd.f32 (!%p162_p2), %v306_v6, %v200_v8 }
   0xa   : > { %v209_v13 = vadd.f32 (!%p162_p2), %v307_v9, %v203_v10 }
   0xb   : > { %v212_v14 = vadd.f32 (!%p162_p2), %v308_v11, %v206_v12 }
   0xc   : > { %v213_v15 = vmul.f32 (!%p162_p2), 0.0025510204, %v209_v13 }
   0xd   : > { %v214_v16 = vmul.f32 0.0025510204, %v212_v14  ;;  %s417_s16 = smov (!%p185_p3, %s296_s16), 3 }
   0xe   : > { %v215_v17 = vmul.f32 %v213_v15, %v213_v15  ;;  %s301_s10 = sshll.u32 %s417_s16, 3 }
   0xf   : > { %s188_s13 = scalar_lea.vmem %s411_s0, %s301_s10  ;;  %s192_s18 = scalar_lea.vmem %s415_s4, %s301_s10 }
  0x10   : > { %v216_v18 = vsub.f32 %v214_v16, %v215_v17  ;;  %v228_v29 = vld [vmem:[%s188_s13] sm:$0xff] }
  0x12   : > { %v217_v19 = vmax.f32 %v216_v18, 0.0 }
  0x14   : > { %v219_v20 = vadd.f32 1e-05, %v217_v19 }
  0x16   : > { %325 = vrsqrt.f32 %v219_v20 }
  0x20   : > { %v326_v23 = vpop.eup %325 }
  0x21   : > { %v221_v24 = vmul.f32 %v326_v23, %v218_v22 }
  0x23   : > { %v222_v25 = vmul.f32 %v221_v24, %v213_v15 }
  0x25   : > { %224 = vrot.lane.b32.xlu0 %v222_v25, %s337_s9 }
  0x29   : > { %231 = vperm.xlu0 %322, %v221_v24  }
  0x2d   : > { %324 = vset.pattern.permute.xlu0 %v336_v21 }
  0x97   : > { %v225_v26 = vpop.permute.xlu0 %224 }
  0x98   : > { %v227_v27 = vsub.f32 %v218_v22, %v225_v26 }
  0x9a   : > { %237 = vperm.xlu1 %323, %v227_v27  }
  0xa8   : > { %v232_v28 = vpop.permute.xlu0 %231 }
  0xa9   : > { %v234_v30 = vmul.f32 %v232_v28, %v228_v29 }
 0x119   : > { %v238_v31 = vpop.permute.xlu1 %237 }
 0x11a   : > { %v240_v32 = vadd.f32 %v238_v31, %v234_v30 }
 0x11c   : > { %v241_v33 = vmax.f32 %v240_v32, 0.0 }
 0x11e   : > { %242 = vst [vmem:[%s192_s18] sm:$0xff] %v241_v33 }
 0x11f PF: > { %s14_s15 = sadd.s32 1, %s333_s15  }
 0x120   : > { %p11_p4 = scmp.ge.s32.totalorder %s14_s15, 6  }
 0x122   :  { %13 = sbr.rel (!%p11_p4) target bundleno = 1 (0x1), region = 72 }

</bundles_post_ra>
